<compile_context>
chip_gen: v5e
topology: v5e:2x2
jax: 0.10.0
libtpu: 0.0.40
codegen_flags: <defaults>
</compile_context>

<pallas_src>
import functools

import jax
import jax.numpy as jnp
from jax import lax
from jax.experimental import pallas as pl
from jax.experimental.pallas import tpu as pltpu

_LANES = 128
_TARGET_BLOCK_ROWS = 1024  # ~512 KiB per f32 input block: safe on v5e/v6e/v7x


def _cdiv(a, b):
    return -(-a // b)


def _focal_loss_kernel(x_ref, t_ref, o_ref, acc_ref, *, alpha, gamma,
                       valid_in_last, tile_rows):
    s = pl.program_id(0)            # parallel split (TensorCore shard)
    b = pl.program_id(1)            # reduction blocks within split
    n_s = pl.num_programs(0)
    n_b = pl.num_programs(1)

    # Zero the running accumulator at the start of each split.
    @pl.when(b == 0)
    def _():
        acc_ref[...] = jnp.zeros_like(acc_ref)

    # Cast to f32 inside the kernel (inputs arrive in their native dtype).
    x = x_ref[...].astype(jnp.float32)
    t = t_ref[...].astype(jnp.float32)

    # Numerically-stable BCE with logits (same formulation PyTorch uses):
    #   bce = max(x, 0) - x*t + log(1 + exp(-|x|))
    bce = jnp.maximum(x, 0.0) - x * t + jnp.log1p(jnp.exp(-jnp.abs(x)))
    pt = jnp.exp(-bce)
    w = 1.0 - pt

    # Integer-power fast path (avoids exp(g*log(w)) EUP work and pow-NaN risk).
    g = float(gamma)
    if g == 2.0:
        wg = w * w
    elif g == 1.0:
        wg = w
    elif g == 0.0:
        wg = jnp.ones_like(w)
    elif g.is_integer() and g > 0.0:
        wg = lax.integer_pow(w, int(g))
    else:
        wg = jnp.power(jnp.maximum(w, 0.0), g)

    focal = (alpha * wg) * bce

    tile_elems = tile_rows * _LANES
    if valid_in_last == tile_elems:
        # No padding anywhere: straight VPU accumulate every step.
        acc_ref[...] += focal
    else:
        # Only the globally-last block contains padded elements.
        is_last = jnp.logical_and(s == n_s - 1, b == n_b - 1)

        @pl.when(jnp.logical_not(is_last))
        def _():
            acc_ref[...] += focal

        @pl.when(is_last)
        def _():
            rid = lax.broadcasted_iota(jnp.int32, focal.shape, 0)
            cid = lax.broadcasted_iota(jnp.int32, focal.shape, 1)
            local = rid * _LANES + cid
            acc_ref[...] += jnp.where(local < valid_in_last, focal, 0.0)

    # End of this split: collapse the accumulator to a lane-dense (8, 128)
    # partial-sum tile (single cross-vreg reduction per split).
    @pl.when(b == n_b - 1)
    def _():
        part = acc_ref[...].reshape(tile_rows // 8, 8, _LANES).sum(axis=0)
        o_ref[...] = part


def focal_loss(inputs, targets, alpha=1.0, gamma=2.0,
               target_block_rows=_TARGET_BLOCK_ROWS):
    """Pallas TPU focal loss. inputs/targets: same shape (e.g. NCHW logits)."""
    assert inputs.shape == targets.shape
    n_valid = int(inputs.size)

    # Flatten only (no astype / no unconditional pad in the wrapper).
    x_flat = jnp.ravel(inputs)
    t_flat = jnp.ravel(targets)

    itemsize = jnp.dtype(inputs.dtype).itemsize
    min_rows = max(8, 32 // max(itemsize, 1))  # 8 (f32) / 16 (bf16) / 32 (i8)

    rows_needed = _cdiv(n_valid, _LANES)
    tile_rows = min(int(target_block_rows),
                    _cdiv(rows_needed, min_rows) * min_rows)
    tile_rows = _cdiv(max(tile_rows, min_rows), min_rows) * min_rows

    n_blocks = _cdiv(rows_needed, tile_rows)
    # Split the reduction 2 ways (dual TensorCore on v7x) when it divides evenly.
    n_splits = 2 if (n_blocks >= 2 and n_blocks % 2 == 0) else 1
    blocks_per_split = n_blocks // n_splits

    padded_rows = n_blocks * tile_rows
    n_pad = padded_rows * _LANES - n_valid
    if n_pad:
        x_flat = jnp.pad(x_flat, (0, n_pad))
        t_flat = jnp.pad(t_flat, (0, n_pad))

    x2 = x_flat.reshape(padded_rows, _LANES)
    t2 = t_flat.reshape(padded_rows, _LANES)

    tile_elems = tile_rows * _LANES
    valid_in_last = tile_elems - n_pad

    in_spec = pl.BlockSpec((tile_rows, _LANES),
                           lambda s, b: (s * blocks_per_split + b, 0))
    out_spec = pl.BlockSpec((8, _LANES), lambda s, b: (s, 0))

    kernel = functools.partial(
        _focal_loss_kernel,
        alpha=float(alpha),
        gamma=float(gamma),
        valid_in_last=int(valid_in_last),
        tile_rows=int(tile_rows),
    )

    partials = pl.pallas_call(
        kernel,
        out_shape=jax.ShapeDtypeStruct((n_splits * 8, _LANES), jnp.float32),
        grid_spec=pltpu.PrefetchScalarGridSpec(
            num_scalar_prefetch=0,
            grid=(n_splits, blocks_per_split),
            in_specs=[in_spec, in_spec],
            out_specs=out_spec,
            scratch_shapes=[pltpu.VMEM((tile_rows, _LANES), jnp.float32)],
        ),
        compiler_params=pltpu.CompilerParams(
            dimension_semantics=("parallel", "arbitrary"),
        ),
    )(x2, t2)

    # Tiny final reduce + mean on the (n_splits*8, 128) partial-sum slab.
    return jnp.sum(partials) * jnp.float32(1.0 / n_valid)


def _focal_loss_ref(inputs, targets, alpha=1.0, gamma=2.0):
    x = inputs.astype(jnp.float32)
    t = targets.astype(jnp.float32)
    bce = jnp.maximum(x, 0.0) - x * t + jnp.log1p(jnp.exp(-jnp.abs(x)))
    pt = jnp.exp(-bce)
    return jnp.mean(alpha * (1.0 - pt) ** gamma * bce)


if __name__ == "__main__":
    key = jax.random.PRNGKey(0)
    k1, k2 = jax.random.split(key)

    # NCHW logits and {0,1} targets, small shapes.
    x = jax.random.normal(k1, (2, 4, 16, 16), dtype=jnp.float32)
    targets = jax.random.bernoulli(k2, p=0.5, shape=(2, 4, 16, 16)).astype(
        jnp.float32)

    loss = focal_loss(x, targets, alpha=1.0, gamma=2.0)
    loss = jax.block_until_ready(loss)

    ref = _focal_loss_ref(x, targets, alpha=1.0, gamma=2.0)
    assert jnp.allclose(loss, ref, atol=1e-5, rtol=1e-5), (loss, ref)

    print("KERNEL_OK")
</pallas_src>

<mosaic_0001>
module attributes {stable_mosaic.version = 11 : i64} {
  func.func @_focal_loss_kernel(%arg0: i32, %arg1: i32, %arg2: memref<16x128xf32, #tpu.memory_space<vmem>>, %arg3: memref<16x128xf32, #tpu.memory_space<vmem>>, %arg4: memref<8x128xf32, #tpu.memory_space<vmem>>, %arg5: memref<16x128xf32, #tpu.memory_space<vmem>>) attributes {dimension_semantics = [#tpu.dimension_semantics<parallel>, #tpu.dimension_semantics<arbitrary>], iteration_bounds = array<i64: 1, 1>, scalar_prefetch = 0 : i64, scratch_operands = 1 : i64, tpu.core_type = #tpu.core_type<tc>, window_params = [{transform_indices = @transform_0, window_bounds = array<i64: 16, 128>}, {transform_indices = @transform_1, window_bounds = array<i64: 16, 128>}, {transform_indices = @transform_2, window_bounds = array<i64: 8, 128>}]} {
    %c0_i32 = arith.constant 0 : i32
    %0 = arith.cmpi eq, %arg1, %c0_i32 : i32
    %1 = arith.extui %0 : i1 to i32
    %c0_i32_0 = arith.constant 0 : i32
    %2 = arith.cmpi ne, %1, %c0_i32_0 : i32
    scf.if %2 {
      %cst_14 = arith.constant 0.000000e+00 : f32
      %30 = vector.broadcast %cst_14 : f32 to vector<16x128xf32>
      %c0_15 = arith.constant 0 : index
      %c0_16 = arith.constant 0 : index
      %31 = vector.load %arg5[%c0_15, %c0_16] : memref<16x128xf32, #tpu.memory_space<vmem>>, vector<16x128xf32>
      tpu.vector_store %arg5[%c0_15, %c0_16], %30 {strides = array<i32>} : memref<16x128xf32, #tpu.memory_space<vmem>>, vector<16x128xf32>,
    } else {
    }
    %c0 = arith.constant 0 : index
    %c0_1 = arith.constant 0 : index
    %3 = vector.load %arg2[%c0, %c0_1] : memref<16x128xf32, #tpu.memory_space<vmem>>, vector<16x128xf32>
    %c0_2 = arith.constant 0 : index
    %c0_3 = arith.constant 0 : index
    %4 = vector.load %arg3[%c0_2, %c0_3] : memref<16x128xf32, #tpu.memory_space<vmem>>, vector<16x128xf32>
    %cst = arith.constant 0.000000e+00 : f32
    %5 = vector.broadcast %cst : f32 to vector<16x128xf32>
    %6 = arith.maximumf %3, %5 : vector<16x128xf32>
    %7 = arith.mulf %3, %4 : vector<16x128xf32>
    %8 = arith.subf %6, %7 : vector<16x128xf32>
    %9 = math.absf %3 : vector<16x128xf32>
    %cst_4 = arith.constant 0.000000e+00 : f32
    %10 = vector.broadcast %cst_4 : f32 to vector<16x128xf32>
    %11 = arith.subf %10, %9 : vector<16x128xf32>
    %12 = math.exp %11 : vector<16x128xf32>
    %13 = math.log1p %12 : vector<16x128xf32>
    %14 = arith.addf %8, %13 : vector<16x128xf32>
    %cst_5 = arith.constant 0.000000e+00 : f32
    %15 = vector.broadcast %cst_5 : f32 to vector<16x128xf32>
    %16 = arith.subf %15, %14 : vector<16x128xf32>
    %17 = math.exp %16 : vector<16x128xf32>
    %cst_6 = arith.constant 1.000000e+00 : f32
    %18 = vector.broadcast %cst_6 : f32 to vector<16x128xf32>
    %19 = arith.subf %18, %17 : vector<16x128xf32>
    %20 = arith.mulf %19, %19 : vector<16x128xf32>
    %cst_7 = arith.constant 1.000000e+00 : f32
    %21 = vector.broadcast %cst_7 : f32 to vector<16x128xf32>
    %22 = arith.mulf %21, %20 : vector<16x128xf32>
    %23 = arith.mulf %22, %14 : vector<16x128xf32>
    %c0_8 = arith.constant 0 : index
    %c0_9 = arith.constant 0 : index
    %24 = vector.load %arg5[%c0_8, %c0_9] : memref<16x128xf32, #tpu.memory_space<vmem>>, vector<16x128xf32>
    %25 = arith.addf %24, %23 : vector<16x128xf32>
    %c0_10 = arith.constant 0 : index
    %c0_11 = arith.constant 0 : index
    %26 = vector.load %arg5[%c0_10, %c0_11] : memref<16x128xf32, #tpu.memory_space<vmem>>, vector<16x128xf32>
    tpu.vector_store %arg5[%c0_10, %c0_11], %25 {strides = array<i32>} : memref<16x128xf32, #tpu.memory_space<vmem>>, vector<16x128xf32>,
    %c0_i32_12 = arith.constant 0 : i32
    %27 = arith.cmpi eq, %arg1, %c0_i32_12 : i32
    %28 = arith.extui %27 : i1 to i32
    %c0_i32_13 = arith.constant 0 : i32
    %29 = arith.cmpi ne, %28, %c0_i32_13 : i32
    scf.if %29 {
      %c0_14 = arith.constant 0 : index
      %c0_15 = arith.constant 0 : index
      %30 = vector.load %arg5[%c0_14, %c0_15] : memref<16x128xf32, #tpu.memory_space<vmem>>, vector<16x128xf32>
      %31 = vector.shape_cast %30 : vector<16x128xf32> to vector<2x8x128xf32>
      %cst_16 = arith.constant dense<0.000000e+00> : vector<8x128xf32>
      %32 = vector.multi_reduction <add>, %31, %cst_16 [0] : vector<2x8x128xf32> to vector<8x128xf32>
      %c0_17 = arith.constant 0 : index
      %c0_18 = arith.constant 0 : index
      %33 = vector.load %arg4[%c0_17, %c0_18] : memref<8x128xf32, #tpu.memory_space<vmem>>, vector<8x128xf32>
      tpu.vector_store %arg4[%c0_17, %c0_18], %32 {strides = array<i32>} : memref<8x128xf32, #tpu.memory_space<vmem>>, vector<8x128xf32>,
    } else {
    }
    return
  }
  func.func @transform_0(%arg0: i32, %arg1: i32) -> (i32, i32) {
    %c1_i32 = arith.constant 1 : i32
    %0 = arith.muli %arg0, %c1_i32 : i32
    %1 = arith.addi %0, %arg1 : i32
    %c0_i32 = arith.constant 0 : i32
    %c0_i32_0 = arith.constant 0 : i32
    return %1, %c0_i32 : i32, i32
  }
  func.func @transform_1(%arg0: i32, %arg1: i32) -> (i32, i32) {
    %c1_i32 = arith.constant 1 : i32
    %0 = arith.muli %arg0, %c1_i32 : i32
    %1 = arith.addi %0, %arg1 : i32
    %c0_i32 = arith.constant 0 : i32
    %c0_i32_0 = arith.constant 0 : i32
    return %1, %c0_i32 : i32, i32
  }
  func.func @transform_2(%arg0: i32, %arg1: i32) -> (i32, i32) {
    %c0_i32 = arith.constant 0 : i32
    %c0_i32_0 = arith.constant 0 : i32
    return %arg0, %c0_i32 : i32, i32
  }
}

</mosaic_0001>

<bundles_post_ra>
// kernel: tpu_custom_call.1
= control target key start
LH: loop header
LB: loop body
LE: loop exit
PB: predicated region body
PF: predicated region fallthrough
CT: control target
= control target key end

     0   :  { %7 = vsyncpa [#allocation4], 0  ;;  %s267_s0 = inlined_call_operand.hbm [shape: f32[16,128], index: 0, kind: input, shape index: {}]   ;;  %s268_s1 = inlined_call_operand.hbm [shape: f32[16,128], index: 1, kind: input, shape index: {}]   ;;  %s269_s2 = inlined_call_operand.hbm [shape: f32[8,128], index: 2, kind: output, shape index: {}]  }
   0x1   :  { %8 = vsyncpa [#allocation7], 0 }
   0x2   :  { %9 = vsyncpa [#allocation5], 0  ;;  %s18_s11 = sshll.u32 %s267_s0, 4  ;;  %s238_s12 = smov [#allocation3]   ;;  %s19_s11 = int_to_ptr.hbm [resolvable:$true] %s18_s11 }
   0x3   :  { %s20_s13 = sshll.u32 %s238_s12, 4  ;;  %s35_s16 = sshll.u32 %s268_s1, 4  ;;  %s21_s13 = int_to_ptr.vmem [resolvable:$true] %s20_s13  ;;  %s36_s16 = int_to_ptr.hbm [resolvable:$true] %s35_s16 }
   0x4   :  { %s239_s17 = smov 128   ;;  %s240_s18 = smov 8  }
   0x5   :  { %26 = dma.hbm_to_vmem [thread:$0]  %s19_s11, 256, %s21_s13, [#allocation4], %s239_s17, %s239_s17, %s240_s18  }
   0x6   :  { %s241_s19 = smov [#allocation6]  }
   0x7   :  { %s37_s20 = sshll.u32 %s241_s19, 4  ;;  %s38_s20 = int_to_ptr.vmem [resolvable:$true] %s37_s20 }
   0x8   :  { %43 = dma.hbm_to_vmem [thread:$0]  %s36_s16, 256, %s38_s20, [#allocation7], %s239_s17, %s239_s17, %s240_s18  }
   0x9   :  { %232 = dma.done.wait [#allocation4], 256  }
   0xa   :  { %233 = vsyncadd [#allocation4], 4294967040 }
   0xb   :  { %234 = dma.done.wait [#allocation7], 256  }
   0xc   :  { %235 = vsyncadd [#allocation7], 4294967040  ;;  %v62_v0 = vld [vmem:[#allocation3] sm:$0xff]  ;;  %v63_v1 = vld [vmem:[#allocation3 + $0x8] sm:$0xff]  ;;  %s242_s0 = smov [#allocation8]   ;;  %s132_s23 = sshll.u32 %s269_s2, 4  ;;  %s133_s23 = int_to_ptr.hbm [resolvable:$true] %s132_s23 }
   0xd   :  { %v72_v2 = vand.u32 2147483647, %v62_v0  ;;  %v73_v3 = vand.u32 2147483647, %v63_v1  ;;  %v64_v12 = vld [vmem:[#allocation6] sm:$0xff]  ;;  %v65_v15 = vld [vmem:[#allocation6 + $0x8] sm:$0xff] }
   0xe   :  { %v66_v17 = vmax.f32 %v62_v0, 0.0  ;;  %v68_v18 = vmul.f32 %v64_v12, %v62_v0  ;;  %v67_v21 = vmax.f32 %v63_v1, 0.0  ;;  %v69_v22 = vmul.f32 %v65_v15, %v63_v1  ;;  %s130_s1 = sshll.u32 %s242_s0, 4  ;;  %s131_s1 = int_to_ptr.vmem [resolvable:$true] %s130_s1 }
   0xf   :  { %v74_v4 = vsub.f32 0.0, %v72_v2  ;;  %v75_v5 = vsub.f32 0.0, %v73_v3 }
  0x10   :  { %v70_v26 = vsub.f32 %v66_v17, %v68_v18  ;;  %v71_v29 = vsub.f32 %v67_v21, %v69_v22 }
  0x11   :  { %v76_v6 = vmul.f32 1.442695, %v74_v4  ;;  %v78_v7 = vmul.f32 1.442695, %v75_v5 }
  0x13   :  { %148 = vpow2.f32 %v76_v6 }
  0x14   :  { %150 = vpow2.f32 %v78_v7 }
  0x19   :  { %v149_v8 = vpop.eup %148 }
  0x1a   :  { %v151_v9 = vpop.eup %150  ;;  %v80_v10 = vadd.f32 1.0, %v149_v8  ;;  %v83_v11 = vmul.f32 -0.5, %v149_v8  ;;  %v86_v19 = vand.u32 2147483647, %v149_v8 }
  0x1b   :  { %v89_v13 = vadd.f32 1.0, %v151_v9  ;;  %v92_v14 = vmul.f32 -0.5, %v151_v9  ;;  %v95_v23 = vand.u32 2147483647, %v151_v9 }
  0x1c   :  { %152 = vlog2.f32 %v80_v10  ;;  %v84_v16 = vadd.f32 1.0, %v83_v11  ;;  %vm87_vm0 = vcmp.lt.f32.partialorder %v86_v19, 0.0004427343 }
  0x1d   :  { %154 = vlog2.f32 %v89_v13  ;;  %v93_v20 = vadd.f32 1.0, %v92_v14  ;;  %vm96_vm1 = vcmp.lt.f32.partialorder %v95_v23, 0.0004427343 }
  0x1e   :  { %v85_v24 = vmul.f32 %v149_v8, %v84_v16 }
  0x1f   :  { %v94_v27 = vmul.f32 %v151_v9, %v93_v20 }
  0x22   :  { %v153_v25 = vpop.eup %152 }
  0x23   :  { %v155_v28 = vpop.eup %154  ;;  %v82_v30 = vmul.f32 0.6931472, %v153_v25 }
  0x24   :  { %v91_v31 = vmul.f32 0.6931472, %v155_v28 }
  0x25   :  { %v88_v32 = vsel %vm87_vm0, %v85_v24, %v82_v30 }
  0x26   :  { %v97_v33 = vsel %vm96_vm1, %v94_v27, %v91_v31  ;;  %v98_v34 = vadd.f32 %v88_v32, %v70_v26 }
  0x27   :  { %v99_v35 = vadd.f32 %v97_v33, %v71_v29 }
  0x28   :  { %v100_v36 = vsub.f32 0.0, %v98_v34 }
  0x29   :  { %v101_v37 = vsub.f32 0.0, %v99_v35 }
  0x2a   :  { %v102_v38 = vmul.f32 1.442695, %v100_v36 }
  0x2b   :  { %v104_v39 = vmul.f32 1.442695, %v101_v37 }
  0x2c   :  { %156 = vpow2.f32 %v102_v38 }
  0x2d   :  { %158 = vpow2.f32 %v104_v39 }
  0x32   :  { %v157_v40 = vpop.eup %156 }
  0x33   :  { %v159_v41 = vpop.eup %158  ;;  %v106_v42 = vsub.f32 1.0, %v157_v40 }
  0x34   :  { %v107_v43 = vsub.f32 1.0, %v159_v41 }
  0x35   :  { %v108_v44 = vmul.f32 %v106_v42, %v106_v42 }
  0x36   :  { %v109_v45 = vmul.f32 %v107_v43, %v107_v43 }
  0x37   :  { %v110_v46 = vmul.f32 %v108_v44, %v98_v34 }
  0x38   :  { %v111_v47 = vmul.f32 %v109_v45, %v99_v35 }
  0x3a   :  { %v123_v48 = vadd.f32 %v111_v47, %v110_v46 }
  0x3c   :  { %124 = vst [vmem:[#allocation8] sm:$0xff] %v123_v48 }
  0x3d   :  { %135 = dma.vmem_to_hbm [thread:$0]  %s131_s1, 128, %s133_s23, [#allocation5]  }
  0x3e   :  { %236 = dma.done.wait [#allocation5], 128  }
  0x3f   :  { %237 = vsyncadd [#allocation5], 4294967168 }
  0x40   :  { %140 = vsyncpa [#allocation4], 1 }
  0x41   :  { %141 = vsyncpa [#allocation7], 1 }
  0x42   :  { %142 = vsyncpa [#allocation5], 1 }

</bundles_post_ra>
